<compile_context>
chip_gen: v7x
topology: tpu7x:2x2x1
jax: 0.10.0
libtpu: 0.0.40
codegen_flags: <defaults>
</compile_context>

<pallas_src>
import functools

import jax
import jax.numpy as jnp
from jax.experimental import pallas as pl
from jax.experimental.pallas import tpu as pltpu


def _cdiv(a, b):
    return -(-a // b)


def _round_up(a, b):
    return _cdiv(a, b) * b


def _gelu_new(x):
    # "gelu_new" (tanh approximation) used by Funnel's default hidden_act.
    c = jnp.sqrt(2.0 / jnp.pi).astype(x.dtype)
    return 0.5 * x * (1.0 + jnp.tanh(c * (x + 0.044715 * (x * x * x))))


def _disc_pred_kernel(x_ref, w1_ref, b1_ref, w2_ref, b2_ref, out_ref, *,
                      mxu_dtype, epilogue_dtype):
    # x_ref:  (tm, D)   token-row tile in its ORIGINAL dtype
    # w1_ref: (D, D)    dense weight (mxu_dtype), applied as x @ W1
    # b1_ref: (1, D)    dense bias, f32
    # w2_ref: (1, D)    dense_prediction weight as a lane-dense row, f32
    # b2_ref: (1,)      dense_prediction bias, f32 scalar in SMEM
    # out_ref:(1, tm)   lane-dense logits row for this tile, f32
    #
    # Cast the activation tile to the MXU dtype here (fused; cheap VPU op hidden
    # under the MXU) instead of a separate HBM-touching XLA astype in the wrapper.
    x = x_ref[...].astype(mxu_dtype)
    h = jnp.dot(x, w1_ref[...], preferred_element_type=jnp.float32)
    h = h + b1_ref[...]                              # bias add in f32
    # gelu_new epilogue; bf16 on v6e/v7x (bf16 VALU/EUP) to relieve the VPU slot,
    # f32 for the exact path (and on v5e via epilogue_dtype=jnp.float32).
    h = _gelu_new(h.astype(epilogue_dtype))          # tanh -> EUP
    # Second projection (N=1): VPU multiply + cross-lane (XLU) reduce instead of
    # an MXU matmul with a single output column; accumulate the sum in f32.
    p = h * w2_ref[...].astype(epilogue_dtype)
    logits = jnp.sum(p, axis=-1, dtype=jnp.float32) + b2_ref[0]    # (tm,)
    out_ref[...] = logits[None, :].astype(out_ref.dtype)           # lane-dense


@functools.partial(jax.jit, static_argnames=("tm", "mxu_dtype", "epilogue_dtype"))
def funnel_discriminator_predictions(x, w1, b1, w2, b2, *, tm=512,
                                     mxu_dtype=jnp.bfloat16,
                                     epilogue_dtype=None):
    """x: [batch, seq, d_model] -> logits: [batch, seq] (f32)."""
    batch, seq, d_model = x.shape
    m = batch * seq

    if epilogue_dtype is None:
        # bf16 elementwise epilogue when the MXU path is bf16 (v6e/v7x have bf16
        # VALU/EUP).  On v5e (no bf16 VPU) pass epilogue_dtype=jnp.float32.
        epilogue_dtype = (jnp.bfloat16
                          if jnp.dtype(mxu_dtype) == jnp.dtype(jnp.bfloat16)
                          else jnp.float32)

    # ---- static tile-size selection ------------------------------------------
    # Big row tiles amortize the ~0.35us per-grid-step overhead, but cap tm so
    # the row grid has >= 2 tiles whenever m allows: on v7x the "parallel" axis
    # shards across the two TensorCores and a single tile would idle one of them.
    tm_eff = min(tm, max(256, _round_up(_cdiv(m, 2), 256)))
    # Never tile (much) past the rows that actually exist; keep sublanes x8.
    tm_eff = max(8, min(tm_eff, _round_up(m, 8)))
    n_tiles = _cdiv(m, tm_eff)     # ragged last tile handled by Pallas directly

    mxu_bytes = jnp.dtype(mxu_dtype).itemsize
    x_bytes = jnp.dtype(x.dtype).itemsize

    # Resident-W1 design: the whole (D, D) weight lives in VMEM for the run.
    # TODO(synk): for d_model large enough that W1 stops fitting comfortably
    # (roughly D >= ~3500 in bf16 on v7x's 64 MiB VMEM), tile W1 over a K grid
    # axis marked "arbitrary" with an f32 VMEM accumulator instead.
    if d_model * d_model * mxu_bytes > 32 * 1024 * 1024:
        raise ValueError("d_model too large for the resident-W1 kernel; "
                         "add a K-tiled accumulator path")

    # No jnp.pad and no wrapper astype: x streams through HBM exactly once in its
    # original dtype; garbage rows of the partial last tile only reach output
    # rows that are sliced off below.
    x2d = x.reshape(m, d_model)
    w1_m = w1.astype(mxu_dtype)                             # tiny one-off cast
    b1_row = b1.reshape(1, d_model).astype(jnp.float32)
    w2_row = w2.reshape(1, d_model).astype(jnp.float32)     # (D, 1) -> (1, D)
    b2_s = b2.reshape(1).astype(jnp.float32)

    # VMEM budget from the actual tile footprint (x double-buffered, weights
    # single-buffered, f32 h / gelu temporaries), 2x headroom, capped for v7x.
    vmem_needed = (2 * tm_eff * d_model * x_bytes        # x tile (double buffer)
                   + d_model * d_model * mxu_bytes       # W1 (single buffer)
                   + 2 * d_model * 4                     # b1 + w2 rows
                   + 2 * tm_eff * 4                      # out row (double buffer)
                   + 4 * tm_eff * d_model * 4)           # f32 h + epilogue temps
    vmem_limit = int(min(max(2 * vmem_needed, 16 * 1024 * 1024),
                         64 * 1024 * 1024))

    cost = pl.CostEstimate(
        flops=2 * m * d_model * d_model + 4 * m * d_model,
        transcendentals=m * d_model,
        bytes_accessed=(m * d_model * x_bytes            # x streamed once
                        + d_model * d_model * mxu_bytes  # W1 (resident)
                        + 2 * d_model * 4                # b1, w2
                        + n_tiles * tm_eff * 4),         # logits out
    )

    kernel = functools.partial(_disc_pred_kernel,
                               mxu_dtype=mxu_dtype,
                               epilogue_dtype=epilogue_dtype)

    out = pl.pallas_call(
        kernel,
        out_shape=jax.ShapeDtypeStruct((n_tiles, tm_eff), jnp.float32),
        grid_spec=pltpu.PrefetchScalarGridSpec(
            num_scalar_prefetch=0,
            grid=(n_tiles,),
            in_specs=[
                # Token-row tile, streamed (default double-buffered pipeline).
                pl.BlockSpec((tm_eff, d_model), lambda i: (i, 0)),
                # Grid-invariant operands: constant block index -> DMA'd once;
                # single-buffered to halve their VMEM footprint.
                pl.BlockSpec((d_model, d_model), lambda i: (0, 0),
                             pipeline_mode=pl.Buffered(1)),          # W1
                pl.BlockSpec((1, d_model), lambda i: (0, 0),
                             pipeline_mode=pl.Buffered(1)),          # b1
                pl.BlockSpec((1, d_model), lambda i: (0, 0),
                             pipeline_mode=pl.Buffered(1)),          # w2 row
                pl.BlockSpec(memory_space=pltpu.MemorySpace.SMEM),   # b2 scalar
            ],
            out_specs=pl.BlockSpec((1, tm_eff), lambda i: (i, 0)),   # lane-dense
        ),
        compiler_params=pltpu.CompilerParams(
            dimension_semantics=("parallel",),      # row grid shards across TCs
            vmem_limit_bytes=vmem_limit,
        ),
        cost_estimate=cost,
    )(x2d, w1_m, b1_row, w2_row, b2_s)

    logits = out.reshape(n_tiles * tm_eff)[:m]
    return logits.reshape(batch, seq)


def _reference(x, w1, b1, w2, b2):
    h = jnp.einsum("bsd,de->bse", x, w1) + b1
    h = _gelu_new(h)
    return (jnp.einsum("bsd,do->bso", h, w2) + b2).squeeze(-1)


def _make_inputs(key, batch, seq, d_model):
    kx, kw1, kb1, kw2, kb2 = jax.random.split(key, 5)
    x = jax.random.normal(kx, (batch, seq, d_model), dtype=jnp.float32)
    scale = 1.0 / jnp.sqrt(d_model)
    w1 = jax.random.uniform(kw1, (d_model, d_model), jnp.float32, -scale, scale)
    b1 = jax.random.uniform(kb1, (d_model,), jnp.float32, -scale, scale)
    w2 = jax.random.uniform(kw2, (d_model, 1), jnp.float32, -scale, scale)
    b2 = jax.random.uniform(kb2, (1,), jnp.float32, -scale, scale)
    return x, w1, b1, w2, b2


if __name__ == "__main__":
    key = jax.random.PRNGKey(0)

    # --- config 1: small Funnel-like shape, single tile -----------------------
    batch, seq, d_model = 2, 8, 32
    x, w1, b1, w2, b2 = _make_inputs(key, batch, seq, d_model)
    ref = _reference(x, w1, b1, w2, b2)

    # Optimized bf16-MXU / bf16-epilogue path (default).
    logits_bf16 = funnel_discriminator_predictions(x, w1, b1, w2, b2)
    jax.block_until_ready(logits_bf16)
    assert logits_bf16.shape == (batch, seq), logits_bf16.shape
    assert jnp.allclose(logits_bf16, ref, atol=2e-2, rtol=2e-2), (
        float(jnp.max(jnp.abs(logits_bf16 - ref))))

    # Full-precision path (f32 MXU + f32 epilogue) for a tight numerical check.
    logits_f32 = funnel_discriminator_predictions(
        x, w1, b1, w2, b2, mxu_dtype=jnp.float32)
    jax.block_until_ready(logits_f32)
    assert jnp.allclose(logits_f32, ref, atol=1e-4, rtol=1e-4), (
        float(jnp.max(jnp.abs(logits_f32 - ref))))

    # --- config 2: multi-tile grid with a ragged tail (no input padding) ------
    batch2, seq2, d_model2 = 3, 100, 64   # m = 300 -> tm 256 -> 2 tiles, ragged
    x2, w12, b12, w22, b22 = _make_inputs(jax.random.PRNGKey(0),
                                          batch2, seq2, d_model2)
    ref2 = _reference(x2, w12, b12, w22, b22)
    logits2 = funnel_discriminator_predictions(x2, w12, b12, w22, b22)
    jax.block_until_ready(logits2)
    assert logits2.shape == (batch2, seq2), logits2.shape
    assert jnp.allclose(logits2, ref2, atol=2e-2, rtol=2e-2), (
        float(jnp.max(jnp.abs(logits2 - ref2))))

    print("KERNEL_OK")
</pallas_src>

<mosaic_0001>
module attributes {stable_mosaic.version = 11 : i64} {
  func.func @_disc_pred_kernel(%arg0: i32, %arg1: memref<16x32xf32, #tpu.memory_space<vmem>>, %arg2: memref<32x32xbf16, #tpu.memory_space<vmem>>, %arg3: memref<1x32xf32, #tpu.memory_space<vmem>>, %arg4: memref<1x32xf32, #tpu.memory_space<vmem>>, %arg5: memref<1xf32, #tpu.memory_space<smem>>, %arg6: memref<1x16xf32, #tpu.memory_space<vmem>>) attributes {dimension_semantics = [#tpu.dimension_semantics<parallel>], iteration_bounds = array<i64: 1>, scalar_prefetch = 0 : i64, scratch_operands = 0 : i64, tpu.core_type = #tpu.core_type<tc>, window_params = [{transform_indices = @transform_0, window_bounds = array<i64: 16, 32>}, {pipeline_mode = #tpu.pipeline_mode<synchronous>, transform_indices = @transform_1, window_bounds = array<i64: 32, 32>}, {pipeline_mode = #tpu.pipeline_mode<synchronous>, transform_indices = @transform_2, window_bounds = array<i64: 1, 32>}, {pipeline_mode = #tpu.pipeline_mode<synchronous>, transform_indices = @transform_3, window_bounds = array<i64: 1, 32>}, {transform_indices = @transform_4, window_bounds = array<i64: 1>}, {transform_indices = @transform_5, window_bounds = array<i64: 1, 16>}]} {
    %c0 = arith.constant 0 : index
    %c0_0 = arith.constant 0 : index
    %0 = vector.load %arg1[%c0, %c0_0] : memref<16x32xf32, #tpu.memory_space<vmem>>, vector<16x32xf32>
    %1 = arith.truncf %0 : vector<16x32xf32> to vector<16x32xbf16>
    %c0_1 = arith.constant 0 : index
    %c0_2 = arith.constant 0 : index
    %2 = vector.load %arg2[%c0_1, %c0_2] : memref<32x32xbf16, #tpu.memory_space<vmem>>, vector<32x32xbf16>
    %cst = arith.constant dense<0.000000e+00> : vector<16x32xf32>
    %3 = tpu.matmul %1, %2, %cst {dimension_numbers = #tpu.dot_dimension_numbers<[1], [0], [0], [1], [0, 0, 1, 1], [], []>} : vector<16x32xbf16>, vector<32x32xbf16>, vector<16x32xf32> -> vector<16x32xf32>
    %c0_3 = arith.constant 0 : index
    %c0_4 = arith.constant 0 : index
    %4 = vector.load %arg3[%c0_3, %c0_4] : memref<1x32xf32, #tpu.memory_space<vmem>>, vector<1x32xf32>
    %5 = vector.broadcast %4 : vector<1x32xf32> to vector<16x32xf32>
    %6 = arith.addf %3, %5 : vector<16x32xf32>
    %7 = arith.truncf %6 : vector<16x32xf32> to vector<16x32xbf16>
    %cst_5 = arith.constant 0.636619746 : f32
    %8 = math.sqrt %cst_5 : f32
    %9 = arith.truncf %8 : f32 to bf16
    %cst_6 = arith.constant 5.000000e-01 : bf16
    %10 = vector.broadcast %cst_6 : bf16 to vector<16x32xbf16>
    %11 = arith.mulf %10, %7 : vector<16x32xbf16>
    %12 = arith.mulf %7, %7 : vector<16x32xbf16>
    %13 = arith.mulf %12, %7 : vector<16x32xbf16>
    %cst_7 = arith.constant 4.467770e-02 : bf16
    %14 = vector.broadcast %cst_7 : bf16 to vector<16x32xbf16>
    %15 = arith.mulf %14, %13 : vector<16x32xbf16>
    %16 = arith.addf %7, %15 : vector<16x32xbf16>
    %17 = vector.broadcast %9 : bf16 to vector<16x32xbf16>
    %18 = arith.mulf %17, %16 : vector<16x32xbf16>
    %19 = math.tanh %18 : vector<16x32xbf16>
    %cst_8 = arith.constant 1.000000e+00 : bf16
    %20 = vector.broadcast %cst_8 : bf16 to vector<16x32xbf16>
    %21 = arith.addf %20, %19 : vector<16x32xbf16>
    %22 = arith.mulf %11, %21 : vector<16x32xbf16>
    %c0_9 = arith.constant 0 : index
    %c0_10 = arith.constant 0 : index
    %23 = vector.load %arg4[%c0_9, %c0_10] : memref<1x32xf32, #tpu.memory_space<vmem>>, vector<1x32xf32>
    %24 = arith.truncf %23 : vector<1x32xf32> to vector<1x32xbf16>
    %25 = vector.broadcast %24 : vector<1x32xbf16> to vector<16x32xbf16>
    %26 = arith.mulf %22, %25 : vector<16x32xbf16>
    %27 = arith.extf %26 : vector<16x32xbf16> to vector<16x32xf32>
    %cst_11 = arith.constant dense<0.000000e+00> : vector<16xf32>
    %28 = vector.multi_reduction <add>, %27, %cst_11 [1] : vector<16x32xf32> to vector<16xf32>
    %c0_12 = arith.constant 0 : index
    %29 = memref.load %arg5[%c0_12] : memref<1xf32, #tpu.memory_space<smem>>
    %30 = vector.broadcast %29 : f32 to vector<16xf32>
    %31 = arith.addf %28, %30 : vector<16xf32>
    %32 = vector.shape_cast %31 : vector<16xf32> to vector<1x16xf32>
    %c0_13 = arith.constant 0 : index
    %c0_14 = arith.constant 0 : index
    %33 = vector.load %arg6[%c0_13, %c0_14] : memref<1x16xf32, #tpu.memory_space<vmem>>, vector<1x16xf32>
    tpu.vector_store %arg6[%c0_13, %c0_14], %32 {strides = array<i32>} : memref<1x16xf32, #tpu.memory_space<vmem>>, vector<1x16xf32>,
    return
  }
  func.func @transform_0(%arg0: i32) -> (i32, i32) {
    %c0_i32 = arith.constant 0 : i32
    %c0_i32_0 = arith.constant 0 : i32
    return %arg0, %c0_i32 : i32, i32
  }
  func.func @transform_1(%arg0: i32) -> (i32, i32) {
    %c0_i32 = arith.constant 0 : i32
    %c0_i32_0 = arith.constant 0 : i32
    %c0_i32_1 = arith.constant 0 : i32
    return %c0_i32, %c0_i32_0 : i32, i32
  }
  func.func @transform_2(%arg0: i32) -> (i32, i32) {
    %c0_i32 = arith.constant 0 : i32
    %c0_i32_0 = arith.constant 0 : i32
    %c0_i32_1 = arith.constant 0 : i32
    return %c0_i32, %c0_i32_0 : i32, i32
  }
  func.func @transform_3(%arg0: i32) -> (i32, i32) {
    %c0_i32 = arith.constant 0 : i32
    %c0_i32_0 = arith.constant 0 : i32
    %c0_i32_1 = arith.constant 0 : i32
    return %c0_i32, %c0_i32_0 : i32, i32
  }
  func.func @transform_4(%arg0: i32) -> i32 {
    %c0_i32 = arith.constant 0 : i32
    %c0_i32_0 = arith.constant 0 : i32
    return %c0_i32 : i32
  }
  func.func @transform_5(%arg0: i32) -> (i32, i32) {
    %c0_i32 = arith.constant 0 : i32
    %c0_i32_0 = arith.constant 0 : i32
    return %arg0, %c0_i32 : i32, i32
  }
}

</mosaic_0001>

<bundles_post_ra>
// kernel: funnel_discriminator_predictions.1
= control target key start
LH: loop header
LB: loop body
LE: loop exit
PB: predicated region body
PF: predicated region fallthrough
CT: control target
= control target key end

     0   :  { %v185_v0 = vmov 0.0   ;;  %vm186_vm0 = vmmov 0   ;;  %vm51_vm1 = vcmask 261120   ;;  %v125_v19 = vlaneseq  ;;  %s244_s1 = inlined_call_operand.vmem [shape: bf16[32,32], index: 1, kind: input, shape index: {}]   ;;  %s245_s0 = inlined_call_operand.vmem [shape: f32[16,32], index: 0, kind: input, shape index: {}]   ;;  %s246_s2 = inlined_call_operand.vmem [shape: f32[1,32], index: 2, kind: input, shape index: {}]   ;;  %s247_s3 = inlined_call_operand.vmem [shape: f32[1,32], index: 3, kind: input, shape index: {}]   ;;  %s248_s4 = inlined_call_operand.<no memory space> [shape: f32[1], index: 4, kind: input, shape index: {}]   ;;  %s249_s5 = inlined_call_operand.vmem [shape: f32[1,16], index: 5, kind: output, shape index: {}]  }
   0x1   :  { %171 = vmatprep.subr.bf16.mxu0 %v185_v0  ;;  %v181_v1 = vld [vmem:[%s244_s1] sm:$0xff]   ;;  %175 = vmatprep.mubr.msk.bf16.mxu0 %vm186_vm0, %v185_v0  ;;  %v182_v2 = vld [vmem:[%s244_s1 + $0x8] sm:$0xff]   ;;  %v139_v37 = vstv %s248_s4  ;;  %vm155_vm2 = vcmask 130112   ;;  %vm158_vm3 = vcmask 122880  }
   0x2   :  { %172 = vmatpush3.bf16.msra.mxu0 %v181_v1  ;;  %v25_v3 = vld [vmem:[%s245_s0] sm:$0xff]  ;;  %v26_v4 = vld [vmem:[%s245_s0 + $0x8] sm:$0xff]  ;;  %v126_v22 = vshrl.u32 %v125_v19, 7  ;;  %v145_v35 = vand.u32 127, %v125_v19 }
   0x3   :  { %173 = vmatprep.subr.bf16.mxu0 %v185_v0  ;;  %v27_v5 = vpack.c.bf16 %v26_v4, %v25_v3  ;;  %v164_v6 = vld [vmem:[%s246_s2] ss:$0 sm:$0xff] }
   0x4   :  { %v120_v20 = vld [vmem:[%s247_s3] sm:$0x1]  ;;  %v127_v24 = vsub.s32 0, %v126_v22  ;;  %v150_v36 = vadd.s32 4294967288, %v145_v35  ;;  %v148_v39 = vsub.s32 %v145_v35, %v126_v22 }
   0x5   :  { %v121_v21 = vpack.c.bf16 %v120_v20, %v120_v20 }
   0x6   :  { %174 = vmatpush3.bf16.msra.mxu0 %v182_v2  ;;  %v153_v41 = vsub.s32 %v150_v36, %v126_v22 }
   0x7   :  { %v123_v23 = vpack.i.b16 %v121_v21, %v121_v21 }
   0x9   :  { %176 = vmatmul.mubr.msk.bf16.vlgmr.msra.gmra.mrb[0].mxu0 %vm51_vm1, %v27_v5  ;;  %v128_v28 = vrot.slane %v123_v23, %v127_v24 }
  0xdc   :  { %v89_v7 = vpop.f32.mrb[0].mxu0 }
  0xdd   :  { %v177_v8 = vpop.f32.mrb[1].mxu0  ;;  %v90_v10 = vadd.f32 %v164_v6, %v89_v7 }
  0xde   :  { %v92_v9 = vpop.f32.mrb[2].mxu0 }
  0xdf   :  { %v93_v11 = vadd.f32 %v164_v6, %v92_v9  ;;  %v178_v12 = vpop.f32.mrb[3].mxu0 }
  0xe1   :  { %v96_v13 = vpack.c.bf16 %v93_v11, %v90_v10 }
  0xe3   :  { %v108_v14 = vmul.bf16 %v96_v13, %v96_v13  ;;  %v107_v26 = vmul.bf16 1056980736, %v96_v13 }
  0xe5   :  { %v109_v15 = vmul.bf16 %v108_v14, %v96_v13 }
  0xe7   :  { %v110_v16 = vmul.bf16 1027030327, %v109_v15 }
  0xe9   :  { %v111_v17 = vadd.bf16 %v110_v16, %v96_v13 }
  0xeb   :  { %v116_v18 = vmul.bf16 0.79784083, %v111_v17 }
  0xed   :  { %183 = vtanh.bf16 %v116_v18 }
  0xf8   :  { %v184_v25 = vpop.eup %183 }
  0xf9   :  { %v118_v27 = vadd.bf16 1065369472, %v184_v25 }
  0xfb   :  { %v119_v29 = vmul.bf16 %v118_v27, %v107_v26 }
  0xfd   :  { %v129_v30 = vmul.bf16 %v128_v28, %v119_v29 }
  0xff   :  { %v130_v31 = vunpack.c.l.bf16 %v129_v30  ;;  %v131_v33 = vunpack.c.h.bf16 %v129_v30 }
 0x101   :  { %v132_v32 = vsel %vm51_vm1, %v130_v31, 0.0  ;;  %v135_v34 = vsel %vm51_vm1, %v131_v33, 0.0 }
 0x102   :  { %133 = vadd.xlane.f32.xlu0 %v132_v32 }
 0x106   :  { %136 = vadd.xlane.f32.xlu0 %v135_v34 }
 0x18f   :  { %v134_v38 = vpop.xlane.xlu0 %133 }
 0x190   :  { %v140_v40 = vadd.f32 %v139_v37, %v134_v38 }
 0x192   :  { %v149_v44 = vrot.slane %v140_v40, %v148_v39 }
 0x193   :  { %v137_v42 = vpop.xlane.xlu0 %136 }
 0x194   :  { %v141_v43 = vadd.f32 %v139_v37, %v137_v42 }
 0x196   :  { %v154_v45 = vrot.slane %v141_v43, %v153_v41 }
 0x198   :  { %v156_v46 = vsel %vm155_vm2, %v154_v45, %v149_v44 }
 0x199   :  { %159 = vst.msk [vmem:[%s249_s5] sm:$0x1] %vm158_vm3, %v156_v46 }

</bundles_post_ra>
